<compile_context>
chip_gen: v7x
topology: tpu7x:2x2x1
jax: 0.10.0
libtpu: 0.0.40
codegen_flags: <defaults>
</compile_context>

<pallas_src>
import functools

import jax
import jax.numpy as jnp
from jax.experimental import pallas as pl
from jax.experimental.pallas import tpu as pltpu

LANE = 128
NEG_INF = -1e30  # padded-logit bias -> exp underflows to exactly 0


def _round_up(x, m):
    return pl.cdiv(x, m) * m


def policy_kernel(x_ref, w1_ref, b1_ref, w2_ref, b2_ref, out_ref, *, out_dim):
    # hidden = relu(x @ W1 + b1)     (padded hidden columns stay exactly 0)
    x = x_ref[...]
    h = jnp.dot(x, w1_ref[...], preferred_element_type=jnp.float32) + b1_ref[...]
    h = jnp.maximum(h, 0.0)
    # logits = h @ W2 + b2           (padded output columns carry a -1e30 bias)
    logits = jnp.dot(h, w2_ref[...], preferred_element_type=jnp.float32) + b2_ref[...]
    # Numerically stable softmax over the full lane axis (padded lanes give 0).
    m = jnp.max(logits, axis=-1, keepdims=True)
    e = jnp.exp(logits - m)
    denom = jnp.sum(e, axis=-1, keepdims=True)
    probs = e * pl.reciprocal(denom, approx=False)
    # Compact store: only the real output columns ever hit HBM.
    out_ref[...] = probs[:, :out_dim].astype(out_ref.dtype)


def pad_params(w1, b1, w2, b2):
    """One-time (init-time) lane padding of the weights/biases."""
    in_dim, hid = w1.shape
    out_dim = w2.shape[1]
    hid_p = _round_up(hid, LANE)
    out_p = _round_up(out_dim, LANE)
    w1_p = jnp.zeros((in_dim, hid_p), jnp.float32).at[:, :hid].set(w1)
    b1_p = jnp.zeros((1, hid_p), jnp.float32).at[0, :hid].set(b1)
    w2_p = jnp.zeros((hid_p, out_p), jnp.float32).at[:hid, :out_dim].set(w2)
    b2_p = jnp.full((1, out_p), NEG_INF, jnp.float32).at[0, :out_dim].set(b2)
    return w1_p, b1_p, w2_p, b2_p


def _choose_tile_b(batch, tile_b):
    """Multiple-of-8 batch tile that keeps the grid >= 4 (>= 2 for tiny B)."""
    b8 = _round_up(batch, 8)
    tile = _round_up(max(int(tile_b), 8), 8)
    if b8 >= 32:
        tile = min(tile, _round_up(pl.cdiv(b8, 4), 8))
    elif b8 >= 16:
        tile = min(tile, _round_up(pl.cdiv(b8, 2), 8))
    else:
        tile = min(tile, b8)
    return tile


@functools.partial(jax.jit, static_argnames=("out_dim", "tile_b"))
def policy_forward(state, w1_p, b1_p, w2_p, b2_p, *, out_dim, tile_b=2048):
    """state: (B, input_dim); params pre-padded via pad_params(); returns (B, out_dim)."""
    B, in_dim = state.shape
    hid_p = w1_p.shape[1]
    out_p = w2_p.shape[1]

    tile_b = _choose_tile_b(B, tile_b)
    b_p = _round_up(B, tile_b)
    grid = (b_p // tile_b,)

    x_p = state.astype(jnp.float32)
    if b_p != B:
        x_p = jnp.zeros((b_p, in_dim), jnp.float32).at[:B].set(x_p)

    cost = pl.CostEstimate(
        flops=2 * b_p * (in_dim * hid_p + hid_p * out_p),
        transcendentals=b_p * out_p,
        bytes_accessed=4 * (b_p * in_dim
                            + in_dim * hid_p + hid_p
                            + hid_p * out_p + out_p
                            + b_p * out_dim),
    )

    out = pl.pallas_call(
        functools.partial(policy_kernel, out_dim=out_dim),
        out_shape=jax.ShapeDtypeStruct((b_p, out_dim), jnp.float32),
        grid=grid,
        in_specs=[
            pl.BlockSpec((tile_b, in_dim), lambda i: (i, 0)),   # state tile (pipelined)
            pl.BlockSpec((in_dim, hid_p), lambda i: (0, 0)),    # W1 (VMEM resident)
            pl.BlockSpec((1, hid_p), lambda i: (0, 0)),         # b1 (resident)
            pl.BlockSpec((hid_p, out_p), lambda i: (0, 0)),     # W2 (resident)
            pl.BlockSpec((1, out_p), lambda i: (0, 0)),         # b2 (resident)
        ],
        out_specs=pl.BlockSpec((tile_b, out_dim), lambda i: (i, 0)),
        compiler_params=pltpu.CompilerParams(
            dimension_semantics=("parallel",),
        ),
        cost_estimate=cost,
    )(x_p, w1_p, b1_p, w2_p, b2_p)

    return out[:B] if b_p != B else out


def init_params(key, input_dim, hidden_dim, output_dim):
    # nn.Linear-style init: U(-1/sqrt(fan_in), 1/sqrt(fan_in)); stored as (in, out).
    k1, k2, k3, k4 = jax.random.split(key, 4)
    lim1 = 1.0 / jnp.sqrt(jnp.float32(input_dim))
    lim2 = 1.0 / jnp.sqrt(jnp.float32(hidden_dim))
    w1 = jax.random.uniform(k1, (input_dim, hidden_dim), jnp.float32, -lim1, lim1)
    b1 = jax.random.uniform(k2, (hidden_dim,), jnp.float32, -lim1, lim1)
    w2 = jax.random.uniform(k3, (hidden_dim, output_dim), jnp.float32, -lim2, lim2)
    b2 = jax.random.uniform(k4, (output_dim,), jnp.float32, -lim2, lim2)
    return w1, b1, w2, b2


if __name__ == "__main__":
    key = jax.random.PRNGKey(0)
    k_state, k_params = jax.random.split(key)

    # CartPole-like policy net; batch is a non-multiple of the tile so the
    # padded-edge and multi-step-grid (4 steps here) paths are exercised.
    B, input_dim, hidden_dim, output_dim = 1000, 4, 32, 2
    state = jax.random.normal(k_state, (B, input_dim), jnp.float32)
    w1, b1, w2, b2 = init_params(k_params, input_dim, hidden_dim, output_dim)
    w1_p, b1_p, w2_p, b2_p = pad_params(w1, b1, w2, b2)   # one-time padding

    probs = policy_forward(state, w1_p, b1_p, w2_p, b2_p,
                           out_dim=output_dim, tile_b=2048)
    probs = jax.block_until_ready(probs)

    # Sanity check against plain-JAX reference.
    h_ref = jnp.maximum(state @ w1 + b1, 0.0)
    logits_ref = h_ref @ w2 + b2
    ref = jax.nn.softmax(logits_ref, axis=-1)
    assert probs.shape == (B, output_dim)
    assert jnp.allclose(probs, ref, atol=1e-5, rtol=1e-5)
    assert jnp.allclose(jnp.sum(probs, axis=-1), 1.0, atol=1e-5)

    print("KERNEL_OK")
</pallas_src>

<mosaic_0001>
module attributes {stable_mosaic.version = 11 : i64} {
  func.func @policy_kernel(%arg0: i32, %arg1: memref<256x4xf32, #tpu.memory_space<vmem>>, %arg2: memref<4x128xf32, #tpu.memory_space<vmem>>, %arg3: memref<1x128xf32, #tpu.memory_space<vmem>>, %arg4: memref<128x128xf32, #tpu.memory_space<vmem>>, %arg5: memref<1x128xf32, #tpu.memory_space<vmem>>, %arg6: memref<256x2xf32, #tpu.memory_space<vmem>>) attributes {dimension_semantics = [#tpu.dimension_semantics<parallel>], iteration_bounds = array<i64: 4>, scalar_prefetch = 0 : i64, scratch_operands = 0 : i64, tpu.core_type = #tpu.core_type<tc>, window_params = [{transform_indices = @transform_0, window_bounds = array<i64: 256, 4>}, {pipeline_mode = #tpu.pipeline_mode<synchronous>, transform_indices = @transform_1, window_bounds = array<i64: 4, 128>}, {pipeline_mode = #tpu.pipeline_mode<synchronous>, transform_indices = @transform_2, window_bounds = array<i64: 1, 128>}, {pipeline_mode = #tpu.pipeline_mode<synchronous>, transform_indices = @transform_3, window_bounds = array<i64: 128, 128>}, {pipeline_mode = #tpu.pipeline_mode<synchronous>, transform_indices = @transform_4, window_bounds = array<i64: 1, 128>}, {transform_indices = @transform_5, window_bounds = array<i64: 256, 2>}]} {
    %c0 = arith.constant 0 : index
    %c0_0 = arith.constant 0 : index
    %0 = vector.load %arg1[%c0, %c0_0] : memref<256x4xf32, #tpu.memory_space<vmem>>, vector<256x4xf32>
    %c0_1 = arith.constant 0 : index
    %c0_2 = arith.constant 0 : index
    %1 = vector.load %arg2[%c0_1, %c0_2] : memref<4x128xf32, #tpu.memory_space<vmem>>, vector<4x128xf32>
    %cst = arith.constant dense<0.000000e+00> : vector<256x128xf32>
    %2 = tpu.matmul %0, %1, %cst {dimension_numbers = #tpu.dot_dimension_numbers<[1], [0], [0], [1], [0, 0, 1, 1], [], []>} : vector<256x4xf32>, vector<4x128xf32>, vector<256x128xf32> -> vector<256x128xf32>
    %c0_3 = arith.constant 0 : index
    %c0_4 = arith.constant 0 : index
    %3 = vector.load %arg3[%c0_3, %c0_4] : memref<1x128xf32, #tpu.memory_space<vmem>>, vector<1x128xf32>
    %4 = vector.broadcast %3 : vector<1x128xf32> to vector<256x128xf32>
    %5 = arith.addf %2, %4 : vector<256x128xf32>
    %cst_5 = arith.constant 0.000000e+00 : f32
    %6 = vector.broadcast %cst_5 : f32 to vector<256x128xf32>
    %7 = arith.maximumf %5, %6 : vector<256x128xf32>
    %c0_6 = arith.constant 0 : index
    %c0_7 = arith.constant 0 : index
    %8 = vector.load %arg4[%c0_6, %c0_7] : memref<128x128xf32, #tpu.memory_space<vmem>>, vector<128x128xf32>
    %cst_8 = arith.constant dense<0.000000e+00> : vector<256x128xf32>
    %9 = tpu.matmul %7, %8, %cst_8 {dimension_numbers = #tpu.dot_dimension_numbers<[1], [0], [0], [1], [0, 0, 1, 1], [], []>} : vector<256x128xf32>, vector<128x128xf32>, vector<256x128xf32> -> vector<256x128xf32>
    %c0_9 = arith.constant 0 : index
    %c0_10 = arith.constant 0 : index
    %10 = vector.load %arg5[%c0_9, %c0_10] : memref<1x128xf32, #tpu.memory_space<vmem>>, vector<1x128xf32>
    %11 = vector.broadcast %10 : vector<1x128xf32> to vector<256x128xf32>
    %12 = arith.addf %9, %11 : vector<256x128xf32>
    %cst_11 = arith.constant dense<0xFF800000> : vector<256xf32>
    %13 = vector.multi_reduction <maximumf>, %12, %cst_11 [1] : vector<256x128xf32> to vector<256xf32>
    %14 = vector.shape_cast %13 : vector<256xf32> to vector<256x1xf32>
    %15 = vector.broadcast %14 : vector<256x1xf32> to vector<256x128xf32>
    %16 = arith.subf %12, %15 : vector<256x128xf32>
    %17 = math.exp %16 : vector<256x128xf32>
    %cst_12 = arith.constant dense<0.000000e+00> : vector<256xf32>
    %18 = vector.multi_reduction <add>, %17, %cst_12 [1] : vector<256x128xf32> to vector<256xf32>
    %19 = vector.shape_cast %18 : vector<256xf32> to vector<256x1xf32>
    %20 = tpu.reciprocal %19 : vector<256x1xf32> -> vector<256x1xf32>
    %21 = vector.broadcast %20 : vector<256x1xf32> to vector<256x128xf32>
    %22 = arith.mulf %17, %21 : vector<256x128xf32>
    %23 = vector.extract_strided_slice %22 {offsets = [0, 0], sizes = [256, 2], strides = [1, 1]} : vector<256x128xf32> to vector<256x2xf32>
    %c0_13 = arith.constant 0 : index
    %c0_14 = arith.constant 0 : index
    %24 = vector.load %arg6[%c0_13, %c0_14] : memref<256x2xf32, #tpu.memory_space<vmem>>, vector<256x2xf32>
    tpu.vector_store %arg6[%c0_13, %c0_14], %23 {strides = array<i32>} : memref<256x2xf32, #tpu.memory_space<vmem>>, vector<256x2xf32>,
    return
  }
  func.func @transform_0(%arg0: i32) -> (i32, i32) {
    %c0_i32 = arith.constant 0 : i32
    %c0_i32_0 = arith.constant 0 : i32
    return %arg0, %c0_i32 : i32, i32
  }
  func.func @transform_1(%arg0: i32) -> (i32, i32) {
    %c0_i32 = arith.constant 0 : i32
    %c0_i32_0 = arith.constant 0 : i32
    %c0_i32_1 = arith.constant 0 : i32
    return %c0_i32, %c0_i32_0 : i32, i32
  }
  func.func @transform_2(%arg0: i32) -> (i32, i32) {
    %c0_i32 = arith.constant 0 : i32
    %c0_i32_0 = arith.constant 0 : i32
    %c0_i32_1 = arith.constant 0 : i32
    return %c0_i32, %c0_i32_0 : i32, i32
  }
  func.func @transform_3(%arg0: i32) -> (i32, i32) {
    %c0_i32 = arith.constant 0 : i32
    %c0_i32_0 = arith.constant 0 : i32
    %c0_i32_1 = arith.constant 0 : i32
    return %c0_i32, %c0_i32_0 : i32, i32
  }
  func.func @transform_4(%arg0: i32) -> (i32, i32) {
    %c0_i32 = arith.constant 0 : i32
    %c0_i32_0 = arith.constant 0 : i32
    %c0_i32_1 = arith.constant 0 : i32
    return %c0_i32, %c0_i32_0 : i32, i32
  }
  func.func @transform_5(%arg0: i32) -> (i32, i32) {
    %c0_i32 = arith.constant 0 : i32
    %c0_i32_0 = arith.constant 0 : i32
    return %arg0, %c0_i32 : i32, i32
  }
}

</mosaic_0001>

<bundles_post_ra>
// kernel: policy_forward.1
= control target key start
LH: loop header
LB: loop body
LE: loop exit
PB: predicated region body
PF: predicated region fallthrough
CT: control target
= control target key end

     0   :  { %s1730_s18 = smov 0   ;;  %s2267_s0 = inlined_call_operand.vmem [shape: f32[1024,4], index: 0, kind: input, shape index: {}]   ;;  %s2268_s1 = inlined_call_operand.vmem [shape: f32[4,128], index: 1, kind: input, shape index: {}]   ;;  %s2269_s2 = inlined_call_operand.vmem [shape: f32[1,128], index: 2, kind: input, shape index: {}]   ;;  %s2270_s3 = inlined_call_operand.vmem [shape: f32[128,128], index: 3, kind: input, shape index: {}]   ;;  %s2271_s4 = inlined_call_operand.vmem [shape: f32[1,128], index: 4, kind: input, shape index: {}]   ;;  %s2272_s5 = inlined_call_operand.vmem [shape: f32[1024,2], index: 5, kind: output, shape index: {}]  }
   0x1 LB: > { %s1251_s19 = sadd.s32 4294967295, %s1698_s18   ;;  %p1255_p0 = scmp.ge.s32.totalorder %s1698_s18, 1  ;;  %s1698_s18 = sphi %s1730_s18, %s15_s18  }
   0x2   : > { %p188_p1 = scmp.lt.s32.totalorder %s1698_s18, 5 }
   0x4   : > { %p189_p2 = pnand %p1255_p0, %p188_p1 }
   0x5   : > { %v260_v0 = vld [vmem:[%s2268_s1] sm:$0xf] (!%p189_p2)  ;;  %vm365_vm0 = vcmask (!%p189_p2), 1043456   ;;  %s1256_s22 = sshll.u32 (!%p189_p2), %s1251_s19, 5  ;;  %v627_v2 = vld [vmem:[%s2270_s3 + $0x8] sm:$0xff] (!%p189_p2)  ;;  %v628_v3 = vld [vmem:[%s2270_s3 + $0x10] sm:$0xff] (!%p189_p2) }
   0x6   : > { %192 = sbr.rel (%p189_p2) target bundleno = 828 (0x33c), region = 40  ;;  %v626_v1 = vld [vmem:[%s2270_s3] sm:$0xff] (!%p189_p2)  ;;  %1378 = vmatprep.subr.msk.mxu0 (!%p189_p2), %vm365_vm0, %v260_v0  ;;  %p217_p3 = scmp.lt.s32.totalorder (!%p189_p2), %s1256_s22, 127  ;;  %v629_v4 = vld [vmem:[%s2270_s3 + $0x18] sm:$0xff] (!%p189_p2)  ;;  %vm268_vm1 = vcmask (!%p189_p2), 31744   ;;  %v631_v8 = vld [vmem:[%s2270_s3 + $0x28] sm:$0xff] (!%p189_p2) }
   0x7   : > { %1379 = vmatpush3.msk.msra.mxu0 (!%p189_p2), %vm365_vm0, %v260_v0  ;;  %v1508_v5 = vpack.c.bf16 (!%p189_p2), %v627_v2, %v626_v1  ;;  %v1512_v6 = vpack.c.bf16 (!%p189_p2), %v629_v4, %v628_v3  ;;  %v630_v7 = vld [vmem:[%s2270_s3 + $0x20] sm:$0xff] (!%p189_p2)  ;;  %v632_v14 = vld [vmem:[%s2270_s3 + $0x30] sm:$0xff] (!%p189_p2)  ;;  %v633_v15 = vld [vmem:[%s2270_s3 + $0x38] sm:$0xff] (!%p189_p2)  ;;  %vm1162_vm2 = vcmask (!%p189_p2), 15360  }
   0x8   : > { %v1516_v12 = vpack.c.bf16 (!%p189_p2), %v631_v8, %v630_v7  ;;  %v1520_v17 = vpack.c.bf16 (!%p189_p2), %v633_v15, %v632_v14  ;;  %v634_v19 = vld [vmem:[%s2270_s3 + $0x40] sm:$0xff] (!%p189_p2)  ;;  %v635_v20 = vld [vmem:[%s2270_s3 + $0x48] sm:$0xff] (!%p189_p2)  ;;  %v636_v24 = vld [vmem:[%s2270_s3 + $0x50] sm:$0xff] (!%p189_p2) }
   0x9   : > { %1509 = vmatprep.subr.bf16.mxu0 (!%p189_p2), %v1508_v5  ;;  %1540 = vmatprep.subr.bf16.mxu1 (!%p189_p2), %v1508_v5  ;;  %v1524_v22 = vpack.c.bf16 (!%p189_p2), %v635_v20, %v634_v19  ;;  %v637_v25 = vld [vmem:[%s2270_s3 + $0x58] sm:$0xff] (!%p189_p2)  ;;  %v638_v29 = vld [vmem:[%s2270_s3 + $0x60] sm:$0xff] (!%p189_p2)  ;;  %v639_v30 = vld [vmem:[%s2270_s3 + $0x68] sm:$0xff] (!%p189_p2) }
   0xa   : > { %1548 = vmatpush3.bf16.msra.mxu1 (!%p189_p2), %v1508_v5  ;;  %v1528_v27 = vpack.c.bf16 (!%p189_p2), %v637_v25, %v636_v24  ;;  %v1532_v32 = vpack.c.bf16 (!%p189_p2), %v639_v30, %v638_v29  ;;  %v640_v34 = vld [vmem:[%s2270_s3 + $0x70] sm:$0xff] (!%p189_p2)  ;;  %v641_v35 = vld [vmem:[%s2270_s3 + $0x78] sm:$0xff] (!%p189_p2)  ;;  %v1866_v57 = vld [vmem:[%s2269_s2] ss:$0 sm:$0xff] (!%p189_p2) }
   0xb   : > { %1541 = vmatprep.subr.bf16.mxu1 (!%p189_p2), %v1512_v6  ;;  %v1536_v37 = vpack.c.bf16 (!%p189_p2), %v641_v35, %v640_v34 }
   0xd   : > { %s2274_s22 = smov (!%p217_p3, %s1256_s22), 127 }
   0xe   : > { %s1257_s6 = sshll.u32 %s2274_s22, 3  ;;  %1549 = vmatpush3.bf16.msra.mxu1 %v1512_v6 }
   0xf   : > { %s1761_s9 = scalar_lea.vmem %s2267_s0, %s1257_s6  ;;  %1542 = vmatprep.subr.bf16.mxu1 %v1516_v12  ;;  %s2166_s19 = scalar_lea.vmem %s2272_s5, %s1257_s6 }
  0x10   : > { %v228_v9 = vld [vmem:[%s1761_s9] sm:$0xff]  ;;  %v229_v10 = vld [vmem:[%s1761_s9 + $0x8] sm:$0xff]  ;;  %v230_v11 = vld [vmem:[%s1761_s9 + $0x10] sm:$0xff] }
  0x11   : > { %1380 = vmatprep.mubr.msk.f32.mxu0 %vm268_vm1, %v228_v9  ;;  %v231_v13 = vld [vmem:[%s1761_s9 + $0x18] sm:$0xff]  ;;  %v232_v16 = vld [vmem:[%s1761_s9 + $0x20] sm:$0xff]  ;;  %v233_v18 = vld [vmem:[%s1761_s9 + $0x28] sm:$0xff] }
  0x12   : > { %1381 = vmatmul.mubr.msk.f32.vlgmr.msra.gmra.mrb[0].mxu0 %vm268_vm1, %v229_v10  ;;  %1550 = vmatpush3.bf16.msra.mxu1 %v1516_v12  ;;  %v234_v21 = vld [vmem:[%s1761_s9 + $0x30] sm:$0xff]  ;;  %v235_v23 = vld [vmem:[%s1761_s9 + $0x38] sm:$0xff]  ;;  %v236_v26 = vld [vmem:[%s1761_s9 + $0x40] sm:$0xff] }
  0x13   : > { %1383 = vmatprep.mubr.msk.f32.mxu0 %vm268_vm1, %v230_v11  ;;  %1511 = vmatpush3.bf16.msra.mxu0 %v1508_v5  ;;  %v237_v28 = vld [vmem:[%s1761_s9 + $0x48] sm:$0xff]  ;;  %v238_v31 = vld [vmem:[%s1761_s9 + $0x50] sm:$0xff]  ;;  %v239_v33 = vld [vmem:[%s1761_s9 + $0x58] sm:$0xff] }
  0x14   : > { %1513 = vmatprep.subr.bf16.mxu0 %v1512_v6  ;;  %1543 = vmatprep.subr.bf16.mxu1 %v1520_v17  ;;  %v240_v36 = vld [vmem:[%s1761_s9 + $0x60] sm:$0xff]  ;;  %v241_v38 = vld [vmem:[%s1761_s9 + $0x68] sm:$0xff]  ;;  %v242_v39 = vld [vmem:[%s1761_s9 + $0x70] sm:$0xff] }
  0x15   : > { %v243_v40 = vld [vmem:[%s1761_s9 + $0x78] sm:$0xff]  ;;  %v244_v41 = vld [vmem:[%s1761_s9 + $0x80] sm:$0xff]  ;;  %v245_v42 = vld [vmem:[%s1761_s9 + $0x88] sm:$0xff] }
  0x16   : > { %1384 = vmatmul.mubr.msk.f32.gmra.mrb[2].mxu0 %vm268_vm1, %v231_v13  ;;  %1551 = vmatpush3.bf16.msra.mxu1 %v1520_v17  ;;  %v246_v43 = vld [vmem:[%s1761_s9 + $0x90] sm:$0xff]  ;;  %v247_v44 = vld [vmem:[%s1761_s9 + $0x98] sm:$0xff]  ;;  %v248_v45 = vld [vmem:[%s1761_s9 + $0xa0] sm:$0xff] }
  0x17   : > { %1386 = vmatprep.mubr.msk.f32.mxu0 %vm268_vm1, %v232_v16  ;;  %1515 = vmatpush3.bf16.msra.mxu0 %v1512_v6  ;;  %v249_v46 = vld [vmem:[%s1761_s9 + $0xa8] sm:$0xff]  ;;  %v250_v47 = vld [vmem:[%s1761_s9 + $0xb0] sm:$0xff]  ;;  %v251_v48 = vld [vmem:[%s1761_s9 + $0xb8] sm:$0xff] }
  0x18   : > { %1517 = vmatprep.subr.bf16.mxu0 %v1516_v12  ;;  %1544 = vmatprep.subr.bf16.mxu1 %v1524_v22  ;;  %v252_v49 = vld [vmem:[%s1761_s9 + $0xc0] sm:$0xff]  ;;  %v253_v50 = vld [vmem:[%s1761_s9 + $0xc8] sm:$0xff]  ;;  %v254_v51 = vld [vmem:[%s1761_s9 + $0xd0] sm:$0xff] }
  0x19   : > { %v255_v52 = vld [vmem:[%s1761_s9 + $0xd8] sm:$0xff]  ;;  %v256_v53 = vld [vmem:[%s1761_s9 + $0xe0] sm:$0xff]  ;;  %v257_v54 = vld [vmem:[%s1761_s9 + $0xe8] sm:$0xff] }
  0x1a   : > { %1387 = vmatmul.mubr.msk.f32.gmra.mrb[4].mxu0 %vm268_vm1, %v233_v18  ;;  %1552 = vmatpush3.bf16.msra.mxu1 %v1524_v22  ;;  %v258_v55 = vld [vmem:[%s1761_s9 + $0xf0] sm:$0xff]  ;;  %v259_v56 = vld [vmem:[%s1761_s9 + $0xf8] sm:$0xff] }
  0x1b   : > { %1389 = vmatprep.mubr.msk.f32.mxu0 %vm268_vm1, %v234_v21  ;;  %1519 = vmatpush3.bf16.msra.mxu0 %v1516_v12 }
  0x1c   : > { %1521 = vmatprep.subr.bf16.mxu0 %v1520_v17  ;;  %1545 = vmatprep.subr.bf16.mxu1 %v1528_v27 }
  0x1e   : > { %1390 = vmatmul.mubr.msk.f32.gmra.mrb[6].mxu0 %vm268_vm1, %v235_v23  ;;  %1553 = vmatpush3.bf16.msra.mxu1 %v1528_v27 }
  0x1f   : > { %1392 = vmatprep.mubr.msk.f32.mxu0 %vm268_vm1, %v236_v26  ;;  %1523 = vmatpush3.bf16.msra.mxu0 %v1520_v17 }
  0x20   : > { %1525 = vmatprep.subr.bf16.mxu0 %v1524_v22  ;;  %1546 = vmatprep.subr.bf16.mxu1 %v1532_v32 }
  0x22   : > { %1393 = vmatmul.mubr.msk.f32.gmra.mrb[8].mxu0 %vm268_vm1, %v237_v28  ;;  %1554 = vmatpush3.bf16.msra.mxu1 %v1532_v32 }
  0x23   : > { %1395 = vmatprep.mubr.msk.f32.mxu0 %vm268_vm1, %v238_v31  ;;  %1527 = vmatpush3.bf16.msra.mxu0 %v1524_v22 }
  0x24   : > { %1529 = vmatprep.subr.bf16.mxu0 %v1528_v27  ;;  %1547 = vmatprep.subr.bf16.mxu1 %v1536_v37 }
  0x26   : > { %1396 = vmatmul.mubr.msk.f32.gmra.mrb[10].mxu0 %vm268_vm1, %v239_v33  ;;  %1555 = vmatpush3.bf16.msra.mxu1 %v1536_v37 }
  0x27   : > { %1398 = vmatprep.mubr.msk.f32.mxu0 %vm268_vm1, %v240_v36  ;;  %1531 = vmatpush3.bf16.msra.mxu0 %v1528_v27 }
  0x28   : > { %1533 = vmatprep.subr.bf16.mxu0 %v1532_v32 }
  0x2a   : > { %1399 = vmatmul.mubr.msk.f32.gmra.mrb[12].mxu0 %vm268_vm1, %v241_v38 }
  0x2b   : > { %1401 = vmatprep.mubr.msk.f32.mxu0 %vm268_vm1, %v242_v39  ;;  %1535 = vmatpush3.bf16.msra.mxu0 %v1532_v32 }
  0x2c   : > { %1537 = vmatprep.subr.bf16.mxu0 %v1536_v37 }
  0x2e   : > { %1402 = vmatmul.mubr.msk.f32.gmra.mrb[14].mxu0 %vm268_vm1, %v243_v40 }
  0x2f   : > { %1404 = vmatprep.mubr.msk.f32.mxu0 %vm268_vm1, %v244_v41  ;;  %1539 = vmatpush3.bf16.msra.mxu0 %v1536_v37 }
  0x32   : > { %1405 = vmatmul.mubr.msk.f32.gmra.mrb[16].mxu0 %vm268_vm1, %v245_v42 }
  0x33   : > { %1407 = vmatprep.mubr.msk.f32.mxu0 %vm268_vm1, %v246_v43 }
  0x36   : > { %1408 = vmatmul.mubr.msk.f32.gmra.mrb[18].mxu0 %vm268_vm1, %v247_v44 }
  0x37   : > { %1410 = vmatprep.mubr.msk.f32.mxu0 %vm268_vm1, %v248_v45 }
  0x3a   : > { %1411 = vmatmul.mubr.msk.f32.gmra.mrb[20].mxu0 %vm268_vm1, %v249_v46 }
  0x3b   : > { %1413 = vmatprep.mubr.msk.f32.mxu0 %vm268_vm1, %v250_v47 }
  0x3e   : > { %1414 = vmatmul.mubr.msk.f32.gmra.mrb[22].mxu0 %vm268_vm1, %v251_v48 }
  0x3f   : > { %1416 = vmatprep.mubr.msk.f32.mxu0 %vm268_vm1, %v252_v49 }
  0x42   : > { %1417 = vmatmul.mubr.msk.f32.gmra.mrb[24].mxu0 %vm268_vm1, %v253_v50 }
  0x43   : > { %1419 = vmatprep.mubr.msk.f32.mxu0 %vm268_vm1, %v254_v51 }
  0x46   : > { %1420 = vmatmul.mubr.msk.f32.gmra.mrb[26].mxu0 %vm268_vm1, %v255_v52 }
  0x47   : > { %1422 = vmatprep.mubr.msk.f32.mxu0 %vm268_vm1, %v256_v53 }
  0x4a   : > { %1423 = vmatmul.mubr.msk.f32.gmra.mrb[28].mxu0 %vm268_vm1, %v257_v54 }
  0x4b   : > { %1425 = vmatprep.mubr.msk.f32.mxu0 %vm268_vm1, %v258_v55 }
  0x4e   : > { %1426 = vmatmul.mubr.msk.f32.gmra.mrb[30].mxu0 %vm268_vm1, %v259_v56 }
  0xe5   : > { %v1382_v58 = vpop.f32.mrb[0].mxu0 }
  0xe6   : > { %v441_v59 = vadd.f32 %v1382_v58, %v1866_v57  ;;  %v435_v60 = vpop.f32.mrb[1].mxu0 }
  0xe7   : > { %v436_v61 = vadd.f32 %v1866_v57, %v435_v60 }
  0xe8   : > { %v595_v0 = vmax.f32 %v441_v59, 0.0 }
  0xe9   : > { %v594_v62 = vmax.f32 %v436_v61, 0.0  ;;  %v1385_v63 = vpop.f32.mrb[2].mxu0 }
  0xea   : > { %v451_v1 = vadd.f32 %v1385_v63, %v1866_v57  ;;  %v445_v2 = vpop.f32.mrb[3].mxu0 }
  0xeb   : > { %v446_v3 = vadd.f32 %v1866_v57, %v445_v2  ;;  %1460 = vmatprep.mubr.f32.mxu0 %v594_v62 }
  0xec   : > { %1461 = vmatmul.mubr.f32.vlgmr.msra.gmra.mrb[32].mxu0 %v595_v0  ;;  %v597_v6 = vmax.f32 %v451_v1, 0.0 }
  0xed   : > { %v596_v4 = vmax.f32 %v446_v3, 0.0  ;;  %v1388_v5 = vpop.f32.mrb[4].mxu0 }
  0xee   : > { %v461_v7 = vadd.f32 %v1388_v5, %v1866_v57  ;;  %v455_v8 = vpop.f32.mrb[5].mxu0 }
  0xef   : > { %v456_v9 = vadd.f32 %v1866_v57, %v455_v8  ;;  %1463 = vmatprep.mubr.f32.mxu0 %v596_v4 }
  0xf0   : > { %v599_v10 = vmax.f32 %v461_v7, 0.0  ;;  %1464 = vmatmul.mubr.f32.gmra.mrb[34].mxu0 %v597_v6 }
  0xf1   : > { %v598_v11 = vmax.f32 %v456_v9, 0.0  ;;  %v1391_v12 = vpop.f32.mrb[6].mxu0 }
  0xf2   : > { %v471_v13 = vadd.f32 %v1391_v12, %v1866_v57  ;;  %v465_v14 = vpop.f32.mrb[7].mxu0 }
  0xf3   : > { %1466 = vmatprep.mubr.f32.mxu0 %v598_v11  ;;  %v466_v15 = vadd.f32 %v1866_v57, %v465_v14 }
  0xf4   : > { %v601_v16 = vmax.f32 %v471_v13, 0.0  ;;  %1467 = vmatmul.mubr.f32.gmra.mrb[36].mxu0 %v599_v10 }
  0xf5   : > { %v1394_v17 = vpop.f32.mrb[8].mxu0  ;;  %v600_v18 = vmax.f32 %v466_v15, 0.0 }
  0xf6   : > { %v481_v19 = vadd.f32 %v1394_v17, %v1866_v57  ;;  %v475_v20 = vpop.f32.mrb[9].mxu0 }
  0xf7   : > { %v476_v21 = vadd.f32 %v1866_v57, %v475_v20  ;;  %1469 = vmatprep.mubr.f32.mxu1 %v600_v18 }
  0xf8   : > { %v603_v22 = vmax.f32 %v481_v19, 0.0  ;;  %1470 = vmatmul.mubr.f32.vlgmr.msra.gmra.mrb[0].mxu1 %v601_v16 }
  0xf9   : > { %v602_v23 = vmax.f32 %v476_v21, 0.0  ;;  %v1397_v24 = vpop.f32.mrb[10].mxu0 }
  0xfa   : > { %v491_v25 = vadd.f32 %v1397_v24, %v1866_v57  ;;  %v485_v26 = vpop.f32.mrb[11].mxu0 }
  0xfb   : > { %v486_v27 = vadd.f32 %v1866_v57, %v485_v26  ;;  %1472 = vmatprep.mubr.f32.mxu1 %v602_v23 }
  0xfc   : > { %v605_v28 = vmax.f32 %v491_v25, 0.0  ;;  %1473 = vmatmul.mubr.f32.gmra.mrb[2].mxu1 %v603_v22 }
  0xfd   : > { %v604_v29 = vmax.f32 %v486_v27, 0.0  ;;  %v1400_v30 = vpop.f32.mrb[12].mxu0  ;;  %v1903_v27 = vld [vmem:[%s2271_s4] ss:$0 sm:$0xff] }
  0xfe   : > { %v501_v31 = vadd.f32 %v1400_v30, %v1866_v57  ;;  %v495_v32 = vpop.f32.mrb[13].mxu0 }
  0xff   : > { %v496_v33 = vadd.f32 %v1866_v57, %v495_v32  ;;  %1475 = vmatprep.mubr.f32.mxu1 %v604_v29 }
 0x100   : > { %v607_v34 = vmax.f32 %v501_v31, 0.0  ;;  %1476 = vmatmul.mubr.f32.gmra.mrb[4].mxu1 %v605_v28 }
 0x101   : > { %v606_v35 = vmax.f32 %v496_v33, 0.0  ;;  %v1403_v36 = vpop.f32.mrb[14].mxu0 }
 0x102   : > { %v511_v37 = vadd.f32 %v1403_v36, %v1866_v57  ;;  %v505_v38 = vpop.f32.mrb[15].mxu0 }
 0x103   : > { %v506_v39 = vadd.f32 %v1866_v57, %v505_v38  ;;  %1478 = vmatprep.mubr.f32.mxu1 %v606_v35 }
 0x104   : > { %v609_v40 = vmax.f32 %v511_v37, 0.0  ;;  %1479 = vmatmul.mubr.f32.gmra.mrb[6].mxu1 %v607_v34 }
 0x105   : > { %v608_v41 = vmax.f32 %v506_v39, 0.0  ;;  %v1406_v42 = vpop.f32.mrb[16].mxu0 }
 0x106   : > { %v521_v43 = vadd.f32 %v1406_v42, %v1866_v57  ;;  %v515_v44 = vpop.f32.mrb[17].mxu0 }
 0x107   : > { %v516_v45 = vadd.f32 %v1866_v57, %v515_v44  ;;  %1481 = vmatprep.mubr.f32.mxu1 %v608_v41 }
 0x108   : > { %v611_v46 = vmax.f32 %v521_v43, 0.0  ;;  %1482 = vmatmul.mubr.f32.gmra.mrb[8].mxu1 %v609_v40 }
 0x109   : > { %v610_v47 = vmax.f32 %v516_v45, 0.0  ;;  %v1409_v48 = vpop.f32.mrb[18].mxu0 }
 0x10a   : > { %v531_v49 = vadd.f32 %v1409_v48, %v1866_v57  ;;  %v525_v50 = vpop.f32.mrb[19].mxu0 }
 0x10b   : > { %v526_v51 = vadd.f32 %v1866_v57, %v525_v50  ;;  %1484 = vmatprep.mubr.f32.mxu1 %v610_v47 }
 0x10c   : > { %v613_v52 = vmax.f32 %v531_v49, 0.0  ;;  %1485 = vmatmul.mubr.f32.gmra.mrb[10].mxu1 %v611_v46 }
 0x10d   : > { %v612_v53 = vmax.f32 %v526_v51, 0.0  ;;  %v1412_v54 = vpop.f32.mrb[20].mxu0 }
 0x10e   : > { %v541_v55 = vadd.f32 %v1412_v54, %v1866_v57  ;;  %v535_v56 = vpop.f32.mrb[21].mxu0 }
 0x10f   : > { %v536_v58 = vadd.f32 %v1866_v57, %v535_v56  ;;  %1487 = vmatprep.mubr.f32.mxu1 %v612_v53 }
 0x110   : > { %v615_v59 = vmax.f32 %v541_v55, 0.0  ;;  %1488 = vmatmul.mubr.f32.gmra.mrb[12].mxu1 %v613_v52 }
 0x111   : > { %v614_v60 = vmax.f32 %v536_v58, 0.0  ;;  %v1415_v61 = vpop.f32.mrb[22].mxu0 }
 0x112   : > { %v551_v62 = vadd.f32 %v1415_v61, %v1866_v57  ;;  %v545_v63 = vpop.f32.mrb[23].mxu0 }
 0x113   : > { %v546_v0 = vadd.f32 %v1866_v57, %v545_v63  ;;  %1490 = vmatprep.mubr.f32.mxu1 %v614_v60 }
 0x114   : > { %v617_v1 = vmax.f32 %v551_v62, 0.0  ;;  %1491 = vmatmul.mubr.f32.gmra.mrb[14].mxu1 %v615_v59 }
 0x115   : > { %v616_v2 = vmax.f32 %v546_v0, 0.0  ;;  %v1418_v3 = vpop.f32.mrb[24].mxu0 }
 0x116   : > { %v561_v4 = vadd.f32 %v1418_v3, %v1866_v57  ;;  %v555_v5 = vpop.f32.mrb[25].mxu0 }
 0x117   : > { %v556_v6 = vadd.f32 %v1866_v57, %v555_v5  ;;  %1493 = vmatprep.mubr.f32.mxu1 %v616_v2 }
 0x118   : > { %v619_v7 = vmax.f32 %v561_v4, 0.0  ;;  %1494 = vmatmul.mubr.f32.gmra.mrb[16].mxu1 %v617_v1 }
 0x119   : > { %v618_v8 = vmax.f32 %v556_v6, 0.0  ;;  %v1421_v9 = vpop.f32.mrb[26].mxu0 }
 0x11a   : > { %v571_v10 = vadd.f32 %v1421_v9, %v1866_v57  ;;  %v565_v11 = vpop.f32.mrb[27].mxu0 }
 0x11b   : > { %v566_v12 = vadd.f32 %v1866_v57, %v565_v11  ;;  %1496 = vmatprep.mubr.f32.mxu1 %v618_v8 }
 0x11c   : > { %v621_v13 = vmax.f32 %v571_v10, 0.0  ;;  %1497 = vmatmul.mubr.f32.gmra.mrb[18].mxu1 %v619_v7 }
 0x11d   : > { %v620_v14 = vmax.f32 %v566_v12, 0.0  ;;  %v1424_v15 = vpop.f32.mrb[28].mxu0 }
 0x11e   : > { %v581_v16 = vadd.f32 %v1424_v15, %v1866_v57  ;;  %v575_v17 = vpop.f32.mrb[29].mxu0 }
 0x11f   : > { %v576_v18 = vadd.f32 %v1866_v57, %v575_v17  ;;  %1499 = vmatprep.mubr.f32.mxu1 %v620_v14 }
 0x120   : > { %v623_v19 = vmax.f32 %v581_v16, 0.0  ;;  %1500 = vmatmul.mubr.f32.gmra.mrb[20].mxu1 %v621_v13 }
 0x121   : > { %v622_v20 = vmax.f32 %v576_v18, 0.0  ;;  %v1427_v21 = vpop.f32.mrb[30].mxu0 }
 0x122   : > { %v591_v22 = vadd.f32 %v1427_v21, %v1866_v57  ;;  %v585_v23 = vpop.f32.mrb[31].mxu0 }
 0x123   : > { %v586_v24 = vadd.f32 %v1866_v57, %v585_v23  ;;  %1502 = vmatprep.mubr.f32.mxu1 %v622_v20 }
 0x124   : > { %v625_v25 = vmax.f32 %v591_v22, 0.0  ;;  %1503 = vmatmul.mubr.f32.gmra.mrb[22].mxu1 %v623_v19 }
 0x125   : > { %v624_v26 = vmax.f32 %v586_v24, 0.0 }
 0x127   : > { %1505 = vmatprep.mubr.f32.mxu1 %v624_v26 }
 0x128   : > { %1506 = vmatmul.mubr.f32.gmra.mrb[24].mxu1 %v625_v25 }
 0x1bf   : > { %v1462_v28 = vpop.f32.mrb[32].mxu0 }
 0x1c0   : > { %v1906_v29 = vadd.f32 %v1462_v28, %v1903_v27  ;;  %v715_v30 = vpop.f32.mrb[33].mxu0 }
 0x1c1   : > { %v1910_v57 = vadd.f32 %v1903_v27, %v715_v30 }
 0x1c2   : > { %876 = vmax.xlane.f32.xlu0 %v1906_v29 }
 0x1c3   : > { %v1465_v31 = vpop.f32.mrb[34].mxu0 }
 0x1c4   : > { %v1913_v32 = vadd.f32 %v1465_v31, %v1903_v27  ;;  %v725_v33 = vpop.f32.mrb[35].mxu0 }
 0x1c5   : > { %v1918_v35 = vadd.f32 %v1903_v27, %v725_v33 }
 0x1c6   : > { %880 = vmax.xlane.f32.xlu1 %v1913_v32  ;;  %874 = vmax.xlane.f32.xlu0 %v1910_v57 }
 0x1c7   : > { %v1468_v34 = vpop.f32.mrb[36].mxu0 }
 0x1c8   : > { %v735_v36 = vpop.f32.mrb[37].mxu0  ;;  %v1926_v39 = vadd.f32 %v1468_v34, %v1903_v27 }
 0x1c9   : > { %v1921_v37 = vadd.f32 %v1903_v27, %v735_v36 }
 0x1ca   : > { %878 = vmax.xlane.f32.xlu1 %v1918_v35 }
 0x1cb   : > { %v1471_v38 = vpop.f32.mrb[0].mxu1  ;;  %882 = vmax.xlane.f32.xlu0 %v1921_v37 }
 0x1cc   : > { %v745_v40 = vpop.f32.mrb[1].mxu1  ;;  %v1934_v43 = vadd.f32 %v1471_v38, %v1903_v27 }
 0x1cd   : > { %v1929_v41 = vadd.f32 %v1903_v27, %v745_v40 }
 0x1ce   : > { %884 = vmax.xlane.f32.xlu1 %v1926_v39 }
 0x1cf   : > { %v1474_v42 = vpop.f32.mrb[2].mxu1  ;;  %886 = vmax.xlane.f32.xlu0 %v1929_v41 }
 0x1d0   : > { %v755_v44 = vpop.f32.mrb[3].mxu1  ;;  %v1942_v47 = vadd.f32 %v1474_v42, %v1903_v27 }
 0x1d1   : > { %v1937_v45 = vadd.f32 %v1903_v27, %v755_v44 }
 0x1d2   : > { %888 = vmax.xlane.f32.xlu1 %v1934_v43 }
 0x1d3   : > { %v1477_v46 = vpop.f32.mrb[4].mxu1  ;;  %890 = vmax.xlane.f32.xlu0 %v1937_v45 }
 0x1d4   : > { %v765_v48 = vpop.f32.mrb[5].mxu1  ;;  %v1950_v51 = vadd.f32 %v1477_v46, %v1903_v27 }
 0x1d5   : > { %v1945_v49 = vadd.f32 %v1903_v27, %v765_v48 }
 0x1d6   : > { %892 = vmax.xlane.f32.xlu1 %v1942_v47 }
 0x1d7   : > { %v1480_v50 = vpop.f32.mrb[6].mxu1  ;;  %894 = vmax.xlane.f32.xlu0 %v1945_v49 }
 0x1d8   : > { %v775_v52 = vpop.f32.mrb[7].mxu1  ;;  %v1958_v55 = vadd.f32 %v1480_v50, %v1903_v27 }
 0x1d9   : > { %v1953_v53 = vadd.f32 %v1903_v27, %v775_v52 }
 0x1da   : > { %896 = vmax.xlane.f32.xlu1 %v1950_v51 }
 0x1db   : > { %v1483_v54 = vpop.f32.mrb[8].mxu1  ;;  %898 = vmax.xlane.f32.xlu0 %v1953_v53 }
 0x1dc   : > { %v785_v56 = vpop.f32.mrb[9].mxu1  ;;  %v1966_v60 = vadd.f32 %v1483_v54, %v1903_v27 }
 0x1dd   : > { %v1961_v58 = vadd.f32 %v1903_v27, %v785_v56 }
 0x1de   : > { %900 = vmax.xlane.f32.xlu1 %v1958_v55 }
 0x1df   : > { %v1486_v59 = vpop.f32.mrb[10].mxu1  ;;  %902 = vmax.xlane.f32.xlu0 %v1961_v58 }
 0x1e0   : > { %v795_v61 = vpop.f32.mrb[11].mxu1  ;;  %v1974_v0 = vadd.f32 %v1486_v59, %v1903_v27 }
 0x1e1   : > { %v1969_v62 = vadd.f32 %v1903_v27, %v795_v61 }
 0x1e2   : > { %904 = vmax.xlane.f32.xlu1 %v1966_v60 }
 0x1e3   : > { %v1489_v63 = vpop.f32.mrb[12].mxu1  ;;  %906 = vmax.xlane.f32.xlu0 %v1969_v62 }
 0x1e4   : > { %v805_v1 = vpop.f32.mrb[13].mxu1  ;;  %v1982_v4 = vadd.f32 %v1489_v63, %v1903_v27 }
 0x1e5   : > { %v1977_v2 = vadd.f32 %v1903_v27, %v805_v1 }
 0x1e6   : > { %908 = vmax.xlane.f32.xlu1 %v1974_v0 }
 0x1e7   : > { %v1492_v3 = vpop.f32.mrb[14].mxu1  ;;  %910 = vmax.xlane.f32.xlu0 %v1977_v2 }
 0x1e8   : > { %v815_v5 = vpop.f32.mrb[15].mxu1  ;;  %v1990_v8 = vadd.f32 %v1492_v3, %v1903_v27 }
 0x1e9   : > { %v1985_v6 = vadd.f32 %v1903_v27, %v815_v5 }
 0x1ea   : > { %912 = vmax.xlane.f32.xlu1 %v1982_v4 }
 0x1eb   : > { %v1495_v7 = vpop.f32.mrb[16].mxu1  ;;  %914 = vmax.xlane.f32.xlu0 %v1985_v6 }
 0x1ec   : > { %v825_v9 = vpop.f32.mrb[17].mxu1  ;;  %v1998_v12 = vadd.f32 %v1495_v7, %v1903_v27 }
 0x1ed   : > { %v1993_v10 = vadd.f32 %v1903_v27, %v825_v9 }
 0x1ee   : > { %916 = vmax.xlane.f32.xlu1 %v1990_v8 }
 0x1ef   : > { %v1498_v11 = vpop.f32.mrb[18].mxu1  ;;  %918 = vmax.xlane.f32.xlu0 %v1993_v10 }
 0x1f0   : > { %v835_v13 = vpop.f32.mrb[19].mxu1  ;;  %v2006_v16 = vadd.f32 %v1498_v11, %v1903_v27 }
 0x1f1   : > { %v2001_v14 = vadd.f32 %v1903_v27, %v835_v13 }
 0x1f2   : > { %920 = vmax.xlane.f32.xlu1 %v1998_v12 }
 0x1f3   : > { %v1501_v15 = vpop.f32.mrb[20].mxu1  ;;  %922 = vmax.xlane.f32.xlu0 %v2001_v14 }
 0x1f4   : > { %v845_v17 = vpop.f32.mrb[21].mxu1  ;;  %v2014_v20 = vadd.f32 %v1501_v15, %v1903_v27 }
 0x1f5   : > { %v2009_v18 = vadd.f32 %v1903_v27, %v845_v17 }
 0x1f6   : > { %924 = vmax.xlane.f32.xlu1 %v2006_v16 }
 0x1f7   : > { %v1504_v19 = vpop.f32.mrb[22].mxu1  ;;  %926 = vmax.xlane.f32.xlu0 %v2009_v18 }
 0x1f8   : > { %v855_v21 = vpop.f32.mrb[23].mxu1  ;;  %v2022_v24 = vadd.f32 %v1504_v19, %v1903_v27 }
 0x1f9   : > { %v2017_v22 = vadd.f32 %v1903_v27, %v855_v21 }
 0x1fa   : > { %928 = vmax.xlane.f32.xlu1 %v2014_v20 }
 0x1fb   : > { %v1507_v23 = vpop.f32.mrb[24].mxu1  ;;  %930 = vmax.xlane.f32.xlu0 %v2017_v22 }
 0x1fc   : > { %v2025_v25 = vadd.f32 %v1507_v23, %v1903_v27  ;;  %v865_v26 = vpop.f32.mrb[25].mxu1 }
 0x1fd   : > { %v2028_v28 = vadd.f32 %v1903_v27, %v865_v26 }
 0x1fe   : > { %932 = vmax.xlane.f32.xlu1 %v2022_v24 }
 0x1ff   : > { %934 = vmax.xlane.f32.xlu0 %v2028_v28 }
 0x202   : > { %936 = vmax.xlane.f32.xlu1 %v2025_v25 }
 0x24f   : > { %v877_v30 = vpop.xlane.xlu0 %876 }
 0x250   : > { %v939_v31 = vsub.f32 %v1906_v29, %v877_v30 }
 0x252   : > { %v972_v33 = vmul.f32 1.442695, %v939_v31 }
 0x253   : > { %v881_v34 = vpop.xlane.xlu1 %880  ;;  %v875_v36 = vpop.xlane.xlu0 %874 }
 0x254   : > { %1564 = vpow2.f32 %v972_v33  ;;  %v941_v38 = vsub.f32 %v1913_v32, %v881_v34  ;;  %v938_v40 = vsub.f32 %v1910_v57, %v875_v36 }
 0x256   : > { %v976_v42 = vmul.f32 1.442695, %v941_v38  ;;  %v970_v27 = vmul.f32 1.442695, %v938_v40 }
 0x257   : > { %v879_v44 = vpop.xlane.xlu1 %878 }
 0x258   : > { %1566 = vpow2.f32 %v976_v42  ;;  %v940_v46 = vsub.f32 %v1918_v35, %v879_v44  ;;  %v883_v48 = vpop.xlane.xlu0 %882 }
 0x259   : > { %1568 = vpow2.f32 %v970_v27  ;;  %v942_v50 = vsub.f32 %v1921_v37, %v883_v48 }
 0x25a   : > { %v974_v52 = vmul.f32 1.442695, %v940_v46 }
 0x25b   : > { %v885_v29 = vpop.xlane.xlu1 %884  ;;  %v978_v59 = vmul.f32 1.442695, %v942_v50 }
 0x25c   : > { %1570 = vpow2.f32 %v974_v52  ;;  %v943_v54 = vsub.f32 %v1926_v39, %v885_v29  ;;  %v887_v56 = vpop.xlane.xlu0 %886 }
 0x25d   : > { %v944_v32 = vsub.f32 %v1929_v41, %v887_v56 }
 0x25e   : > { %v2040_v57 = vpop.eup %1564  ;;  %v980_v61 = vmul.f32 1.442695, %v943_v54 }
 0x25f   : > { %1036 = vadd.xlane.f32.xlu1 %v2040_v57  ;;  %v889_v63 = vpop.xlane.xlu1 %888  ;;  %v982_v37 = vmul.f32 1.442695, %v944_v32 }
 0x260   : > { %1572 = vpow2.f32 %v980_v61  ;;  %v945_v35 = vsub.f32 %v1934_v43, %v889_v63  ;;  %v891_v1 = vpop.xlane.xlu0 %890 }
 0x261   : > { %1574 = vpow2.f32 %v978_v59  ;;  %v946_v3 = vsub.f32 %v1937_v45, %v891_v1 }
 0x262   : > { %v2045_v5 = vpop.eup %1566  ;;  %v984_v39 = vmul.f32 1.442695, %v945_v35 }
 0x263   : > { %v2047_v7 = vpop.eup %1568  ;;  %1040 = vadd.xlane.f32.xlu1 %v2045_v5  ;;  %v893_v41 = vpop.xlane.xlu1 %892  ;;  %v986_v43 = vmul.f32 1.442695, %v946_v3 }
 0x264   : > { %1576 = vpow2.f32 %v984_v39  ;;  %v947_v9 = vsub.f32 %v1942_v47, %v893_v41  ;;  %1034 = vadd.xlane.f32.xlu0 %v2047_v7  ;;  %v895_v11 = vpop.xlane.xlu0 %894 }
 0x265   : > { %1578 = vpow2.f32 %v982_v37  ;;  %v948_v13 = vsub.f32 %v1945_v49, %v895_v11 }
 0x266   : > { %v2053_v15 = vpop.eup %1570  ;;  %v988_v45 = vmul.f32 1.442695, %v947_v9 }
 0x267   : > { %v897_v17 = vpop.xlane.xlu1 %896  ;;  %v990_v23 = vmul.f32 1.442695, %v948_v13 }
 0x268   : > { %1580 = vpow2.f32 %v988_v45  ;;  %v949_v19 = vsub.f32 %v1950_v51, %v897_v17  ;;  %1038 = vadd.xlane.f32.xlu0 %v2053_v15  ;;  %v899_v21 = vpop.xlane.xlu0 %898 }
 0x269   : > { %1582 = vpow2.f32 %v986_v43  ;;  %v950_v47 = vsub.f32 %v1953_v53, %v899_v21 }
 0x26a   : > { %v2058_v26 = vpop.eup %1572  ;;  %v992_v30 = vmul.f32 1.442695, %v949_v19 }
 0x26b   : > { %v2060_v31 = vpop.eup %1574  ;;  %1044 = vadd.xlane.f32.xlu1 %v2058_v26  ;;  %v901_v49 = vpop.xlane.xlu1 %900  ;;  %v994_v34 = vmul.f32 1.442695, %v950_v47 }
 0x26c   : > { %1584 = vpow2.f32 %v992_v30  ;;  %v951_v33 = vsub.f32 %v1958_v55, %v901_v49  ;;  %1042 = vadd.xlane.f32.xlu0 %v2060_v31  ;;  %v903_v51 = vpop.xlane.xlu0 %902 }
 0x26d   : > { %1586 = vpow2.f32 %v990_v23  ;;  %v952_v36 = vsub.f32 %v1961_v58, %v903_v51 }
 0x26e   : > { %v2066_v38 = vpop.eup %1576  ;;  %v996_v53 = vmul.f32 1.442695, %v951_v33 }
 0x26f   : > { %v2068_v40 = vpop.eup %1578  ;;  %1048 = vadd.xlane.f32.xlu1 %v2066_v38  ;;  %v905_v42 = vpop.xlane.xlu1 %904  ;;  %v998_v44 = vmul.f32 1.442695, %v952_v36 }
 0x270   : > { %1588 = vpow2.f32 %v996_v53  ;;  %v953_v27 = vsub.f32 %v1966_v60, %v905_v42  ;;  %1046 = vadd.xlane.f32.xlu0 %v2068_v40  ;;  %v907_v55 = vpop.xlane.xlu0 %906 }
 0x271   : > { %1590 = vpow2.f32 %v994_v34  ;;  %v954_v46 = vsub.f32 %v1969_v62, %v907_v55 }
 0x272   : > { %v2074_v48 = vpop.eup %1580  ;;  %v1000_v58 = vmul.f32 1.442695, %v953_v27 }
 0x273   : > { %v2076_v50 = vpop.eup %1582  ;;  %1052 = vadd.xlane.f32.xlu1 %v2074_v48  ;;  %v909_v52 = vpop.xlane.xlu1 %908  ;;  %v1002_v54 = vmul.f32 1.442695, %v954_v46 }
 0x274   : > { %1592 = vpow2.f32 %v1000_v58  ;;  %v955_v29 = vsub.f32 %v1974_v0, %v909_v52  ;;  %1050 = vadd.xlane.f32.xlu0 %v2076_v50  ;;  %v911_v60 = vpop.xlane.xlu0 %910 }
 0x275   : > { %1594 = vpow2.f32 %v998_v44  ;;  %v956_v56 = vsub.f32 %v1977_v2, %v911_v60 }
 0x276   : > { %v2082_v59 = vpop.eup %1584  ;;  %v1004_v62 = vmul.f32 1.442695, %v955_v29 }
 0x277   : > { %v2084_v32 = vpop.eup %1586  ;;  %1056 = vadd.xlane.f32.xlu1 %v2082_v59  ;;  %v913_v61 = vpop.xlane.xlu1 %912  ;;  %v1006_v35 = vmul.f32 1.442695, %v956_v56 }
 0x278   : > { %1596 = vpow2.f32 %v1004_v62  ;;  %v957_v63 = vsub.f32 %v1982_v4, %v913_v61  ;;  %1054 = vadd.xlane.f32.xlu0 %v2084_v32  ;;  %v915_v0 = vpop.xlane.xlu0 %914 }
 0x279   : > { %1598 = vpow2.f32 %v1002_v54  ;;  %v958_v1 = vsub.f32 %v1985_v6, %v915_v0 }
 0x27a   : > { %v2090_v37 = vpop.eup %1588  ;;  %v1008_v2 = vmul.f32 1.442695, %v957_v63 }
 0x27b   : > { %v2092_v3 = vpop.eup %1590  ;;  %1060 = vadd.xlane.f32.xlu1 %v2090_v37  ;;  %v917_v39 = vpop.xlane.xlu1 %916  ;;  %v1010_v9 = vmul.f32 1.442695, %v958_v1 }
 0x27c   : > { %1600 = vpow2.f32 %v1008_v2  ;;  %v959_v41 = vsub.f32 %v1990_v8, %v917_v39  ;;  %1058 = vadd.xlane.f32.xlu0 %v2092_v3  ;;  %v919_v4 = vpop.xlane.xlu0 %918 }
 0x27d   : > { %1602 = vpow2.f32 %v1006_v35  ;;  %v960_v11 = vsub.f32 %v1993_v10, %v919_v4 }
 0x27e   : > { %v2098_v43 = vpop.eup %1592  ;;  %v1012_v6 = vmul.f32 1.442695, %v959_v41 }
 0x27f   : > { %v2100_v13 = vpop.eup %1594  ;;  %1064 = vadd.xlane.f32.xlu1 %v2098_v43  ;;  %v921_v45 = vpop.xlane.xlu1 %920  ;;  %v1014_v19 = vmul.f32 1.442695, %v960_v11 }
 0x280   : > { %1604 = vpow2.f32 %v1012_v6  ;;  %v961_v17 = vsub.f32 %v1998_v12, %v921_v45  ;;  %1062 = vadd.xlane.f32.xlu0 %v2100_v13  ;;  %v923_v8 = vpop.xlane.xlu0 %922 }
 0x281   : > { %1606 = vpow2.f32 %v1010_v9  ;;  %v962_v21 = vsub.f32 %v2001_v14, %v923_v8 }
 0x282   : > { %v2106_v23 = vpop.eup %1596  ;;  %v1016_v10 = vmul.f32 1.442695, %v961_v17 }
 0x283   : > { %v2108_v47 = vpop.eup %1598  ;;  %1068 = vadd.xlane.f32.xlu1 %v2106_v23  ;;  %v925_v30 = vpop.xlane.xlu1 %924  ;;  %v1018_v33 = vmul.f32 1.442695, %v962_v21 }
 0x284   : > { %1608 = vpow2.f32 %v1016_v10  ;;  %v963_v49 = vsub.f32 %v2006_v16, %v925_v30  ;;  %1066 = vadd.xlane.f32.xlu0 %v2108_v47  ;;  %v927_v12 = vpop.xlane.xlu0 %926 }
 0x285   : > { %1610 = vpow2.f32 %v1014_v19  ;;  %v964_v51 = vsub.f32 %v2009_v18, %v927_v12 }
 0x286   : > { %v2114_v34 = vpop.eup %1600  ;;  %v1020_v14 = vmul.f32 1.442695, %v963_v49 }
 0x287   : > { %v2116_v36 = vpop.eup %1602  ;;  %1072 = vadd.xlane.f32.xlu1 %v2114_v34  ;;  %v929_v53 = vpop.xlane.xlu1 %928  ;;  %v1022_v27 = vmul.f32 1.442695, %v964_v51 }
 0x288   : > { %1612 = vpow2.f32 %v1020_v14  ;;  %v965_v42 = vsub.f32 %v2014_v20, %v929_v53  ;;  %1070 = vadd.xlane.f32.xlu0 %v2116_v36  ;;  %v931_v16 = vpop.xlane.xlu0 %930 }
 0x289   : > { %1614 = vpow2.f32 %v1018_v33  ;;  %v966_v55 = vsub.f32 %v2017_v22, %v931_v16 }
 0x28a   : > { %v2122_v44 = vpop.eup %1604  ;;  %v1024_v18 = vmul.f32 1.442695, %v965_v42 }
 0x28b   : > { %v2124_v46 = vpop.eup %1606  ;;  %1076 = vadd.xlane.f32.xlu1 %v2122_v44  ;;  %v933_v58 = vpop.xlane.xlu1 %932  ;;  %v1026_v29 = vmul.f32 1.442695, %v966_v55 }
 0x28c   : > { %1616 = vpow2.f32 %v1024_v18  ;;  %v967_v52 = vsub.f32 %v2022_v24, %v933_v58  ;;  %1074 = vadd.xlane.f32.xlu0 %v2124_v46  ;;  %v935_v20 = vpop.xlane.xlu0 %934 }
 0x28d   : > { %1618 = vpow2.f32 %v1022_v27  ;;  %v968_v60 = vsub.f32 %v2028_v28, %v935_v20 }
 0x28e   : > { %v2130_v54 = vpop.eup %1608  ;;  %v1028_v22 = vmul.f32 1.442695, %v967_v52 }
 0x28f   : > { %v2132_v56 = vpop.eup %1610  ;;  %1080 = vadd.xlane.f32.xlu1 %v2130_v54  ;;  %v937_v62 = vpop.xlane.xlu1 %936  ;;  %v1030_v24 = vmul.f32 1.442695, %v968_v60 }
 0x290   : > { %1620 = vpow2.f32 %v1028_v22  ;;  %v969_v61 = vsub.f32 %v2025_v25, %v937_v62  ;;  %1078 = vadd.xlane.f32.xlu0 %v2132_v56 }
 0x291   : > { %1622 = vpow2.f32 %v1026_v29 }
 0x292   : > { %v2137_v63 = vpop.eup %1612  ;;  %v1032_v0 = vmul.f32 1.442695, %v969_v61 }
 0x293   : > { %v2139_v35 = vpop.eup %1614  ;;  %1084 = vadd.xlane.f32.xlu1 %v2137_v63 }
 0x294   : > { %1624 = vpow2.f32 %v1032_v0  ;;  %1082 = vadd.xlane.f32.xlu0 %v2139_v35 }
 0x295   : > { %1626 = vpow2.f32 %v1030_v24 }
 0x296   : > { %v2143_v28 = vpop.eup %1616 }
 0x297   : > { %v2145_v1 = vpop.eup %1618  ;;  %1088 = vadd.xlane.f32.xlu1 %v2143_v28 }
 0x298   : > { %1086 = vadd.xlane.f32.xlu0 %v2145_v1 }
 0x29a   : > { %v2149_v25 = vpop.eup %1620 }
 0x29b   : > { %v2151_v2 = vpop.eup %1622  ;;  %1092 = vadd.xlane.f32.xlu1 %v2149_v25 }
 0x29c   : > { %1090 = vadd.xlane.f32.xlu0 %v2151_v2 }
 0x29e   : > { %v2155_v39 = vpop.eup %1624 }
 0x29f   : > { %v2157_v41 = vpop.eup %1626  ;;  %1096 = vadd.xlane.f32.xlu1 %v2155_v39 }
 0x2a0   : > { %1094 = vadd.xlane.f32.xlu0 %v2157_v41 }
 0x2ec   : > { %v1037_v4 = vpop.xlane.xlu1 %1036 }
 0x2ed   : > { %1628 = vrcp.f32 %v1037_v4 }
 0x2f0   : > { %v1041_v9 = vpop.xlane.xlu1 %1040 }
 0x2f1   : > { %1630 = vrcp.f32 %v1041_v9  ;;  %v1035_v11 = vpop.xlane.xlu0 %1034 }
 0x2f2   : > { %1632 = vrcp.f32 %v1035_v11 }
 0x2f5   : > { %v1039_v6 = vpop.xlane.xlu0 %1038 }
 0x2f6   : > { %1634 = vrcp.f32 %v1039_v6 }
 0x2f7   : > { %v1629_v45 = vpop.eup %1628 }
 0x2f8   : > { %v1131_v17 = vmul.f32 %v1629_v45, %v2040_v57  ;;  %v1045_v8 = vpop.xlane.xlu1 %1044 }
 0x2f9   : > { %1636 = vrcp.f32 %v1045_v8  ;;  %v1043_v19 = vpop.xlane.xlu0 %1042 }
 0x2fa   : > { %1164 = vst.msk [vmem:[%s2166_s19 + $0x8] sm:$0xff] %vm1162_vm2, %v1131_v17  ;;  %1638 = vrcp.f32 %v1043_v19 }
 0x2fb   : > { %v1631_v21 = vpop.eup %1630 }
 0x2fc   : > { %v1633_v10 = vpop.eup %1632  ;;  %v1133_v30 = vmul.f32 %v1631_v21, %v2045_v5  ;;  %v1049_v49 = vpop.xlane.xlu1 %1048 }
 0x2fd   : > { %v1130_v12 = vmul.f32 %v1633_v10, %v2047_v7  ;;  %1640 = vrcp.f32 %v1049_v49  ;;  %v1047_v33 = vpop.xlane.xlu0 %1046 }
 0x2fe   : > { %1166 = vst.msk [vmem:[%s2166_s19 + $0x18] sm:$0xff] %vm1162_vm2, %v1133_v30  ;;  %1642 = vrcp.f32 %v1047_v33 }
 0x2ff   : > { %1163 = vst.msk [vmem:[%s2166_s19] sm:$0xff] %vm1162_vm2, %v1130_v12 }
 0x300   : > { %v1635_v57 = vpop.eup %1634  ;;  %v1053_v51 = vpop.xlane.xlu1 %1052 }
 0x301   : > { %v1132_v14 = vmul.f32 %v1635_v57, %v2053_v15  ;;  %1644 = vrcp.f32 %v1053_v51  ;;  %v1051_v53 = vpop.xlane.xlu0 %1050 }
 0x302   : > { %1646 = vrcp.f32 %v1051_v53 }
 0x303   : > { %v1637_v5 = vpop.eup %1636  ;;  %1165 = vst.msk [vmem:[%s2166_s19 + $0x10] sm:$0xff] %vm1162_vm2, %v1132_v14 }
 0x304   : > { %v1639_v7 = vpop.eup %1638  ;;  %v1135_v42 = vmul.f32 %v1637_v5, %v2058_v26  ;;  %v1057_v16 = vpop.xlane.xlu1 %1056 }
 0x305   : > { %v1134_v27 = vmul.f32 %v1639_v7, %v2060_v31  ;;  %1648 = vrcp.f32 %v1057_v16  ;;  %v1055_v55 = vpop.xlane.xlu0 %1054 }
 0x306   : > { %1168 = vst.msk [vmem:[%s2166_s19 + $0x28] sm:$0xff] %vm1162_vm2, %v1135_v42  ;;  %1650 = vrcp.f32 %v1055_v55 }
 0x307   : > { %v1641_v15 = vpop.eup %1640  ;;  %1167 = vst.msk [vmem:[%s2166_s19 + $0x20] sm:$0xff] %vm1162_vm2, %v1134_v27 }
 0x308   : > { %v1643_v18 = vpop.eup %1642  ;;  %v1137_v58 = vmul.f32 %v1641_v15, %v2066_v38  ;;  %v1061_v52 = vpop.xlane.xlu1 %1060 }
 0x309   : > { %v1136_v20 = vmul.f32 %v1643_v18, %v2068_v40  ;;  %1652 = vrcp.f32 %v1061_v52  ;;  %v1059_v26 = vpop.xlane.xlu0 %1058 }
 0x30a   : > { %1170 = vst.msk [vmem:[%s2166_s19 + $0x38] sm:$0xff] %vm1162_vm2, %v1137_v58  ;;  %1654 = vrcp.f32 %v1059_v26 }
 0x30b   : > { %v1645_v31 = vpop.eup %1644  ;;  %1169 = vst.msk [vmem:[%s2166_s19 + $0x30] sm:$0xff] %vm1162_vm2, %v1136_v20 }
 0x30c   : > { %v1647_v29 = vpop.eup %1646  ;;  %v1139_v60 = vmul.f32 %v1645_v31, %v2074_v48  ;;  %v1065_v22 = vpop.xlane.xlu1 %1064 }
 0x30d   : > { %v1138_v62 = vmul.f32 %v1647_v29, %v2076_v50  ;;  %1656 = vrcp.f32 %v1065_v22  ;;  %v1063_v38 = vpop.xlane.xlu0 %1062 }
 0x30e   : > { %1172 = vst.msk [vmem:[%s2166_s19 + $0x48] sm:$0xff] %vm1162_vm2, %v1139_v60  ;;  %1658 = vrcp.f32 %v1063_v38 }
 0x30f   : > { %v1649_v40 = vpop.eup %1648  ;;  %1171 = vst.msk [vmem:[%s2166_s19 + $0x40] sm:$0xff] %vm1162_vm2, %v1138_v62 }
 0x310   : > { %v1651_v61 = vpop.eup %1650  ;;  %v1141_v24 = vmul.f32 %v1649_v40, %v2082_v59  ;;  %v1069_v0 = vpop.xlane.xlu1 %1068 }
 0x311   : > { %v1140_v4 = vmul.f32 %v1651_v61, %v2084_v32  ;;  %1660 = vrcp.f32 %v1069_v0  ;;  %v1067_v48 = vpop.xlane.xlu0 %1066 }
 0x312   : > { %1174 = vst.msk [vmem:[%s2166_s19 + $0x58] sm:$0xff] %vm1162_vm2, %v1141_v24  ;;  %1662 = vrcp.f32 %v1067_v48 }
 0x313   : > { %v1653_v50 = vpop.eup %1652  ;;  %1173 = vst.msk [vmem:[%s2166_s19 + $0x50] sm:$0xff] %vm1162_vm2, %v1140_v4 }
 0x314   : > { %v1655_v9 = vpop.eup %1654  ;;  %v1143_v11 = vmul.f32 %v1653_v50, %v2090_v37  ;;  %v1073_v6 = vpop.xlane.xlu1 %1072 }
 0x315   : > { %v1142_v45 = vmul.f32 %v1655_v9, %v2092_v3  ;;  %1664 = vrcp.f32 %v1073_v6  ;;  %v1071_v59 = vpop.xlane.xlu0 %1070 }
 0x316   : > { %1176 = vst.msk [vmem:[%s2166_s19 + $0x68] sm:$0xff] %vm1162_vm2, %v1143_v11  ;;  %1666 = vrcp.f32 %v1071_v59 }
 0x317   : > { %v1657_v32 = vpop.eup %1656  ;;  %1175 = vst.msk [vmem:[%s2166_s19 + $0x60] sm:$0xff] %vm1162_vm2, %v1142_v45 }
 0x318   : > { %v1659_v17 = vpop.eup %1658  ;;  %v1145_v8 = vmul.f32 %v1657_v32, %v2098_v43  ;;  %v1077_v19 = vpop.xlane.xlu1 %1076 }
 0x319   : > { %v1144_v21 = vmul.f32 %v1659_v17, %v2100_v13  ;;  %1668 = vrcp.f32 %v1077_v19  ;;  %v1075_v37 = vpop.xlane.xlu0 %1074 }
 0x31a   : > { %1178 = vst.msk [vmem:[%s2166_s19 + $0x78] sm:$0xff] %vm1162_vm2, %v1145_v8  ;;  %1670 = vrcp.f32 %v1075_v37 }
 0x31b   : > { %v1661_v3 = vpop.eup %1660  ;;  %1177 = vst.msk [vmem:[%s2166_s19 + $0x70] sm:$0xff] %vm1162_vm2, %v1144_v21 }
 0x31c   : > { %v1663_v10 = vpop.eup %1662  ;;  %v1147_v30 = vmul.f32 %v1661_v3, %v2106_v23  ;;  %v1081_v49 = vpop.xlane.xlu1 %1080 }
 0x31d   : > { %v1146_v12 = vmul.f32 %v1663_v10, %v2108_v47  ;;  %1672 = vrcp.f32 %v1081_v49  ;;  %v1079_v43 = vpop.xlane.xlu0 %1078 }
 0x31e   : > { %1180 = vst.msk [vmem:[%s2166_s19 + $0x88] sm:$0xff] %vm1162_vm2, %v1147_v30  ;;  %1674 = vrcp.f32 %v1079_v43 }
 0x31f   : > { %v1665_v13 = vpop.eup %1664  ;;  %1179 = vst.msk [vmem:[%s2166_s19 + $0x80] sm:$0xff] %vm1162_vm2, %v1146_v12 }
 0x320   : > { %v1667_v33 = vpop.eup %1666  ;;  %v1149_v57 = vmul.f32 %v1665_v13, %v2114_v34  ;;  %v1085_v51 = vpop.xlane.xlu1 %1084 }
 0x321   : > { %v1148_v14 = vmul.f32 %v1667_v33, %v2116_v36  ;;  %1676 = vrcp.f32 %v1085_v51  ;;  %v1083_v23 = vpop.xlane.xlu0 %1082 }
 0x322   : > { %1182 = vst.msk [vmem:[%s2166_s19 + $0x98] sm:$0xff] %vm1162_vm2, %v1149_v57  ;;  %1678 = vrcp.f32 %v1083_v23 }
 0x323   : > { %v1669_v47 = vpop.eup %1668  ;;  %1181 = vst.msk [vmem:[%s2166_s19 + $0x90] sm:$0xff] %vm1162_vm2, %v1148_v14 }
 0x324   : > { %v1671_v53 = vpop.eup %1670  ;;  %v1151_v5 = vmul.f32 %v1669_v47, %v2122_v44  ;;  %v1089_v7 = vpop.xlane.xlu1 %1088 }
 0x325   : > { %v1150_v42 = vmul.f32 %v1671_v53, %v2124_v46  ;;  %1680 = vrcp.f32 %v1089_v7  ;;  %v1087_v34 = vpop.xlane.xlu0 %1086 }
 0x326   : > { %1184 = vst.msk [vmem:[%s2166_s19 + $0xa8] sm:$0xff] %vm1162_vm2, %v1151_v5  ;;  %1682 = vrcp.f32 %v1087_v34 }
 0x327   : > { %v1673_v36 = vpop.eup %1672  ;;  %1183 = vst.msk [vmem:[%s2166_s19 + $0xa0] sm:$0xff] %vm1162_vm2, %v1150_v42 }
 0x328   : > { %v1675_v16 = vpop.eup %1674  ;;  %v1153_v27 = vmul.f32 %v1673_v36, %v2130_v54  ;;  %v1093_v55 = vpop.xlane.xlu1 %1092 }
 0x329   : > { %v1152_v15 = vmul.f32 %v1675_v16, %v2132_v56  ;;  %1684 = vrcp.f32 %v1093_v55  ;;  %v1091_v44 = vpop.xlane.xlu0 %1090 }
 0x32a   : > { %1186 = vst.msk [vmem:[%s2166_s19 + $0xb8] sm:$0xff] %vm1162_vm2, %v1153_v27  ;;  %1686 = vrcp.f32 %v1091_v44 }
 0x32b   : > { %v1677_v46 = vpop.eup %1676  ;;  %1185 = vst.msk [vmem:[%s2166_s19 + $0xb0] sm:$0xff] %vm1162_vm2, %v1152_v15 }
 0x32c   : > { %v1679_v18 = vpop.eup %1678  ;;  %v1155_v58 = vmul.f32 %v1677_v46, %v2137_v63  ;;  %v1097_v52 = vpop.xlane.xlu1 %1096 }
 0x32d   : > { %v1154_v54 = vmul.f32 %v1679_v18, %v2139_v35  ;;  %1688 = vrcp.f32 %v1097_v52  ;;  %v1095_v56 = vpop.xlane.xlu0 %1094 }
 0x32e   : > { %1188 = vst.msk [vmem:[%s2166_s19 + $0xc8] sm:$0xff] %vm1162_vm2, %v1155_v58  ;;  %1690 = vrcp.f32 %v1095_v56 }
 0x32f   : > { %v1681_v20 = vpop.eup %1680  ;;  %1187 = vst.msk [vmem:[%s2166_s19 + $0xc0] sm:$0xff] %vm1162_vm2, %v1154_v54 }
 0x330   : > { %v1683_v26 = vpop.eup %1682  ;;  %v1157_v31 = vmul.f32 %v1681_v20, %v2143_v28 }
 0x331   : > { %v1156_v63 = vmul.f32 %v1683_v26, %v2145_v1 }
 0x332   : > { %1190 = vst.msk [vmem:[%s2166_s19 + $0xd8] sm:$0xff] %vm1162_vm2, %v1157_v31 }
 0x333   : > { %v1685_v35 = vpop.eup %1684  ;;  %1189 = vst.msk [vmem:[%s2166_s19 + $0xd0] sm:$0xff] %vm1162_vm2, %v1156_v63 }
 0x334   : > { %v1687_v29 = vpop.eup %1686  ;;  %v1159_v60 = vmul.f32 %v1685_v35, %v2149_v25 }
 0x335   : > { %v1158_v22 = vmul.f32 %v1687_v29, %v2151_v2 }
 0x336   : > { %1192 = vst.msk [vmem:[%s2166_s19 + $0xe8] sm:$0xff] %vm1162_vm2, %v1159_v60 }
 0x337   : > { %v1689_v62 = vpop.eup %1688  ;;  %1191 = vst.msk [vmem:[%s2166_s19 + $0xe0] sm:$0xff] %vm1162_vm2, %v1158_v22 }
 0x338   : > { %v1691_v38 = vpop.eup %1690  ;;  %v1161_v28 = vmul.f32 %v1689_v62, %v2155_v39 }
 0x339   : > { %v1160_v1 = vmul.f32 %v1691_v38, %v2157_v41 }
 0x33a   : > { %1194 = vst.msk [vmem:[%s2166_s19 + $0xf8] sm:$0xff] %vm1162_vm2, %v1161_v28 }
 0x33b   : > { %1193 = vst.msk [vmem:[%s2166_s19 + $0xf0] sm:$0xff] %vm1162_vm2, %v1160_v1 }
 0x33c PF: > { %s15_s18 = sadd.s32 1, %s1698_s18  }
 0x33d   : > { %p12_p4 = scmp.ge.s32.totalorder %s15_s18, 6  }
 0x33f   :  { %14 = sbr.rel (!%p12_p4) target bundleno = 1 (0x1), region = 70 }

</bundles_post_ra>
